<compile_context>
chip_gen: v7x
topology: tpu7x:2x2x1
jax: 0.10.0
libtpu: 0.0.40
codegen_flags: <defaults>
</compile_context>

<pallas_src>
import jax
import jax.numpy as jnp
from jax.experimental import pallas as pl
from jax.experimental.pallas import tpu as pltpu

_LANE = 512            # lane-dense last dim (multiple of 128)
_MAX_BLOCK_ROWS = 1024 # 1024 x 512 f32 = 2 MiB per tile buffer


def _relu_kernel(x_ref, o_ref):
    # Elementwise max(x, 0) on the VPU; scalar splat avoids a zero tile.
    o_ref[...] = jnp.maximum(x_ref[...], 0.0)


def _round_up(v: int, m: int) -> int:
    return ((v + m - 1) // m) * m


@jax.jit
def relu_pallas(x: jax.Array) -> jax.Array:
    """ReLU over an arbitrarily shaped array via a tiled, lane-dense Pallas kernel."""
    orig_shape = x.shape
    orig_dtype = x.dtype
    n = x.size

    # Flatten & zero-pad into a (rows_padded, _LANE) slab whose block shape
    # satisfies the (8, 128) tiling rule and divides the padded array evenly.
    rows = pl.cdiv(n, _LANE)
    block_rows = min(_MAX_BLOCK_ROWS, _round_up(rows, 8))
    rows_padded = _round_up(rows, block_rows)
    padded_n = rows_padded * _LANE

    flat = x.reshape(-1)
    flat = jnp.pad(flat, (0, padded_n - n))  # ReLU(0) == 0, so zero pad is safe
    slab = flat.reshape(rows_padded, _LANE)

    grid = (rows_padded // block_rows,)
    out = pl.pallas_call(
        _relu_kernel,
        out_shape=jax.ShapeDtypeStruct((rows_padded, _LANE), orig_dtype),
        grid=grid,
        in_specs=[pl.BlockSpec((block_rows, _LANE), lambda i: (i, 0))],
        out_specs=pl.BlockSpec((block_rows, _LANE), lambda i: (i, 0)),
        compiler_params=pltpu.CompilerParams(
            dimension_semantics=("parallel",),
        ),
        cost_estimate=pl.CostEstimate(
            flops=n,
            bytes_accessed=2 * n * x.dtype.itemsize,
            transcendentals=0,
        ),
    )(slab)

    return out.reshape(-1)[:n].reshape(orig_shape)


if __name__ == "__main__":
    # 1) The exact tensor from the PyTorch script.
    x_fixed = jnp.array([[1.0, -0.5], [-1.0, 3.0]], dtype=jnp.float32)
    out_fixed = jax.block_until_ready(relu_pallas(x_fixed))
    assert jnp.allclose(out_fixed, jnp.maximum(x_fixed, 0.0)), (
        out_fixed, jnp.maximum(x_fixed, 0.0))

    # 2) A small random, nicely tiled shape.
    key = jax.random.PRNGKey(0)
    k1, k2 = jax.random.split(key)
    x_rand = jax.random.normal(k1, (128, 512), dtype=jnp.float32)
    out_rand = jax.block_until_ready(relu_pallas(x_rand))
    assert jnp.allclose(out_rand, jnp.maximum(x_rand, 0.0))

    # 3) A small non-aligned shape to exercise the pad/slice path.
    x_odd = jax.random.normal(k2, (7, 33), dtype=jnp.float32)
    out_odd = jax.block_until_ready(relu_pallas(x_odd))
    assert jnp.allclose(out_odd, jnp.maximum(x_odd, 0.0))

    print("KERNEL_OK")
</pallas_src>

<mosaic_0001>
module attributes {stable_mosaic.version = 11 : i64} {
  func.func @_relu_kernel(%arg0: i32, %arg1: memref<8x512xf32, #tpu.memory_space<vmem>>, %arg2: memref<8x512xf32, #tpu.memory_space<vmem>>) attributes {dimension_semantics = [#tpu.dimension_semantics<parallel>], iteration_bounds = array<i64: 1>, scalar_prefetch = 0 : i64, scratch_operands = 0 : i64, tpu.core_type = #tpu.core_type<tc>, window_params = [{transform_indices = @transform_0, window_bounds = array<i64: 8, 512>}, {transform_indices = @transform_1, window_bounds = array<i64: 8, 512>}]} {
    %c0 = arith.constant 0 : index
    %c0_0 = arith.constant 0 : index
    %0 = vector.load %arg1[%c0, %c0_0] : memref<8x512xf32, #tpu.memory_space<vmem>>, vector<8x512xf32>
    %cst = arith.constant 0.000000e+00 : f32
    %1 = vector.broadcast %cst : f32 to vector<8x512xf32>
    %2 = arith.maximumf %0, %1 : vector<8x512xf32>
    %c0_1 = arith.constant 0 : index
    %c0_2 = arith.constant 0 : index
    %3 = vector.load %arg2[%c0_1, %c0_2] : memref<8x512xf32, #tpu.memory_space<vmem>>, vector<8x512xf32>
    tpu.vector_store %arg2[%c0_1, %c0_2], %2 {strides = array<i32>} : memref<8x512xf32, #tpu.memory_space<vmem>>, vector<8x512xf32>,
    return
  }
  func.func @transform_0(%arg0: i32) -> (i32, i32) {
    %c0_i32 = arith.constant 0 : i32
    %c0_i32_0 = arith.constant 0 : i32
    return %arg0, %c0_i32 : i32, i32
  }
  func.func @transform_1(%arg0: i32) -> (i32, i32) {
    %c0_i32 = arith.constant 0 : i32
    %c0_i32_0 = arith.constant 0 : i32
    return %arg0, %c0_i32 : i32, i32
  }
}

</mosaic_0001>

<bundles_post_ra>
// kernel: relu_pallas.1
= control target key start
LH: loop header
LB: loop body
LE: loop exit
PB: predicated region body
PF: predicated region fallthrough
CT: control target
= control target key end

     0   :  { %s58_s0 = inlined_call_operand.vmem [shape: f32[8,512], index: 0, kind: input, shape index: {}]   ;;  %s59_s1 = inlined_call_operand.vmem [shape: f32[8,512], index: 1, kind: output, shape index: {}]  }
   0x1   :  { %v8_v0 = vld [vmem:[%s58_s0] sm:$0xff]  ;;  %v9_v1 = vld [vmem:[%s58_s0 + $0x8] sm:$0xff]  ;;  %v10_v2 = vld [vmem:[%s58_s0 + $0x10] sm:$0xff] }
   0x2   :  { %v12_v3 = vmax.f32 %v8_v0, 0.0  ;;  %v13_v4 = vmax.f32 %v9_v1, 0.0  ;;  %v14_v5 = vmax.f32 %v10_v2, 0.0  ;;  %v11_v6 = vld [vmem:[%s58_s0 + $0x18] sm:$0xff] }
   0x3   :  { %v15_v7 = vmax.f32 %v11_v6, 0.0 }
   0x4   :  { %16 = vst [vmem:[%s59_s1] sm:$0xff] %v12_v3  ;;  %17 = vst [vmem:[%s59_s1 + $0x8] sm:$0xff] %v13_v4 }
   0x5   :  { %18 = vst [vmem:[%s59_s1 + $0x10] sm:$0xff] %v14_v5  ;;  %19 = vst [vmem:[%s59_s1 + $0x18] sm:$0xff] %v15_v7 }

</bundles_post_ra>
